<compile_context>
chip_gen: v7x
topology: tpu7x:2x2x1
jax: 0.10.0
libtpu: 0.0.40
codegen_flags: <defaults>
</compile_context>

<pallas_src>
import jax
import jax.numpy as jnp
from jax.experimental import pallas as pl
from jax.experimental.pallas import tpu as pltpu

LANE = 128  # vreg lane width


def _round_up(x, m):
    return ((x + m - 1) // m) * m


def _pad_to(arr, shape):
    return jnp.pad(arr, [(0, s - d) for d, s in zip(arr.shape, shape)])


# ----------------------------------------------------------------------------
# Fused Pallas kernel: 3 GCNConv layers, activations stay on-chip.
# ----------------------------------------------------------------------------
def _fused_gcn3_kernel(a_ref, dinv_ref, x_ref, w1_ref, b1_ref, w2_ref,
                       b2_ref, w3_ref, b3_ref, o_ref):
    a = a_ref[...]            # bf16 [N, N] = A + I (exact small integers)
    dinv = dinv_ref[...]      # f32  [N, 1] = D^-1/2 (0 on padded rows)

    def gcn_conv(h, w_ref, b_ref):
        # A_hat @ (H @ W) + b with the D^-1/2 normalization folded in as two
        # VPU row scales around the MXU matmul (hides under MXU slack).
        hw = jnp.dot(h.astype(jnp.bfloat16), w_ref[...],
                     preferred_element_type=jnp.float32)
        hw = (hw * dinv).astype(jnp.bfloat16)              # right D^-1/2
        agg = jnp.dot(a, hw, preferred_element_type=jnp.float32)
        return agg * dinv + b_ref[...]                     # left D^-1/2 + bias

    h = jnp.maximum(gcn_conv(x_ref[...], w1_ref, b1_ref), 0.0)   # layer 1 + relu
    h = jnp.maximum(gcn_conv(h, w2_ref, b2_ref), 0.0)            # layer 2 + relu
    o_ref[...] = gcn_conv(h, w3_ref, b3_ref).astype(o_ref.dtype)  # layer 3


def gcn3_fused(a_plus_i, d_inv_sqrt, x, params):
    """Full 3-layer GCN forward in one pallas_call (lane-dense padded)."""
    (w1, b1), (w2, b2), (w3, b3) = params
    n, f_in = x.shape
    n_p = a_plus_i.shape[0]
    hid = w1.shape[1]
    f_out = w3.shape[1]

    f_in_p = _round_up(f_in, LANE)
    hid_p = _round_up(hid, LANE)
    f_out_p = _round_up(f_out, LANE)

    # bf16 matmul operands (f32 accumulation inside the kernel), f32 biases.
    x_p = _pad_to(x, (n_p, f_in_p)).astype(jnp.bfloat16)
    w1_p = _pad_to(w1, (f_in_p, hid_p)).astype(jnp.bfloat16)
    w2_p = _pad_to(w2, (hid_p, hid_p)).astype(jnp.bfloat16)
    w3_p = _pad_to(w3, (hid_p, f_out_p)).astype(jnp.bfloat16)
    b1_p = _pad_to(b1.reshape(1, -1), (1, hid_p)).astype(jnp.float32)
    b2_p = _pad_to(b2.reshape(1, -1), (1, hid_p)).astype(jnp.float32)
    b3_p = _pad_to(b3.reshape(1, -1), (1, f_out_p)).astype(jnp.float32)

    # Explicit VMEM budget: operands + output + a few f32 activation temps.
    operand_bytes = (
        a_plus_i.size * 2 + x_p.size * 2
        + (w1_p.size + w2_p.size + w3_p.size) * 2
        + (b1_p.size + b2_p.size + b3_p.size) * 4
        + d_inv_sqrt.size * 4
        + n_p * f_out_p * 4
        + 4 * n_p * hid_p * 4)
    vmem_limit = int(min(100 * 2**20, max(4 * 2**20, 2 * operand_bytes)))

    vmem = pl.BlockSpec(memory_space=pltpu.MemorySpace.VMEM)
    out_p = pl.pallas_call(
        _fused_gcn3_kernel,
        out_shape=jax.ShapeDtypeStruct((n_p, f_out_p), jnp.float32),
        in_specs=[vmem] * 9,
        out_specs=vmem,
        compiler_params=pltpu.CompilerParams(vmem_limit_bytes=vmem_limit),
    )(a_plus_i, d_inv_sqrt, x_p, w1_p, b1_p, w2_p, b2_p, w3_p, b3_p)

    return out_p[:n, :f_out]


# ----------------------------------------------------------------------------
# Glue: A+I built directly in padded bf16 layout (scatter-add, duplicate edges
# counted exactly like torch_geometric), degrees from an O(E) bincount.
# ----------------------------------------------------------------------------
def build_padded_adjacency(edge_index, num_nodes):
    n_p = _round_up(num_nodes, LANE)
    src, dst = edge_index[0], edge_index[1]
    diag = jnp.arange(num_nodes, dtype=edge_index.dtype)

    a = jnp.zeros((n_p, n_p), jnp.bfloat16)
    a = a.at[dst, src].add(1.0)          # out[dst] <- sum over src
    a = a.at[diag, diag].add(1.0)        # self loops on real nodes only

    real = (jnp.arange(n_p) < num_nodes).astype(jnp.float32)
    deg = jnp.zeros((n_p,), jnp.float32).at[dst].add(1.0) + real
    d_inv_sqrt = jnp.where(deg > 0.0, jax.lax.rsqrt(deg), 0.0)
    return a, d_inv_sqrt.reshape(n_p, 1)


def glorot(key, fan_in, fan_out):
    limit = (6.0 / (fan_in + fan_out)) ** 0.5
    return jax.random.uniform(key, (fan_in, fan_out), jnp.float32, -limit, limit)


def gcn_forward(params, x, edge_index, num_nodes):
    a_plus_i, d_inv_sqrt = build_padded_adjacency(edge_index, num_nodes)
    return gcn3_fused(a_plus_i, d_inv_sqrt, x, params)


if __name__ == "__main__":
    key = jax.random.PRNGKey(0)
    N, IN_FEATS, HID, OUT_FEATS, E = 16, 8, 32, 4, 24

    k_x, k_src, k_off, k_w1, k_w2, k_w3 = jax.random.split(key, 6)

    # node features
    x = jax.random.normal(k_x, (N, IN_FEATS), dtype=jnp.float32)

    # random undirected edge_index [2, 2E] with no self loops
    src = jax.random.randint(k_src, (E,), 0, N)
    off = jax.random.randint(k_off, (E,), 1, N)
    dst = (src + off) % N
    edge_index = jnp.stack(
        [jnp.concatenate([src, dst]), jnp.concatenate([dst, src])]
    ).astype(jnp.int32)

    # deterministic GCNConv params (glorot weights, zero bias — PyG defaults)
    params = [
        (glorot(k_w1, IN_FEATS, HID), jnp.zeros((HID,), jnp.float32)),
        (glorot(k_w2, HID, HID), jnp.zeros((HID,), jnp.float32)),
        (glorot(k_w3, HID, OUT_FEATS), jnp.zeros((OUT_FEATS,), jnp.float32)),
    ]

    out = gcn_forward(params, x, edge_index, N)
    jax.block_until_ready(out)
    assert out.shape == (N, OUT_FEATS)
    print("KERNEL_OK")
</pallas_src>

<mosaic_0001>
module attributes {stable_mosaic.version = 11 : i64} {
  func.func @_fused_gcn3_kernel(%arg0: memref<128x128xbf16, #tpu.memory_space<vmem>>, %arg1: memref<128x1xf32, #tpu.memory_space<vmem>>, %arg2: memref<128x128xbf16, #tpu.memory_space<vmem>>, %arg3: memref<128x128xbf16, #tpu.memory_space<vmem>>, %arg4: memref<1x128xf32, #tpu.memory_space<vmem>>, %arg5: memref<128x128xbf16, #tpu.memory_space<vmem>>, %arg6: memref<1x128xf32, #tpu.memory_space<vmem>>, %arg7: memref<128x128xbf16, #tpu.memory_space<vmem>>, %arg8: memref<1x128xf32, #tpu.memory_space<vmem>>, %arg9: memref<128x128xf32, #tpu.memory_space<vmem>>) attributes {dimension_semantics = [], scalar_prefetch = 0 : i64, scratch_operands = 0 : i64, tpu.core_type = #tpu.core_type<tc>} {
    %c0 = arith.constant 0 : index
    %c0_0 = arith.constant 0 : index
    %0 = vector.load %arg0[%c0, %c0_0] : memref<128x128xbf16, #tpu.memory_space<vmem>>, vector<128x128xbf16>
    %c0_1 = arith.constant 0 : index
    %c0_2 = arith.constant 0 : index
    %1 = vector.load %arg1[%c0_1, %c0_2] : memref<128x1xf32, #tpu.memory_space<vmem>>, vector<128x1xf32>
    %c0_3 = arith.constant 0 : index
    %c0_4 = arith.constant 0 : index
    %2 = vector.load %arg2[%c0_3, %c0_4] : memref<128x128xbf16, #tpu.memory_space<vmem>>, vector<128x128xbf16>
    %c0_5 = arith.constant 0 : index
    %c0_6 = arith.constant 0 : index
    %3 = vector.load %arg3[%c0_5, %c0_6] : memref<128x128xbf16, #tpu.memory_space<vmem>>, vector<128x128xbf16>
    %cst = arith.constant dense<0.000000e+00> : vector<128x128xf32>
    %4 = tpu.matmul %2, %3, %cst {dimension_numbers = #tpu.dot_dimension_numbers<[1], [0], [0], [1], [0, 0, 1, 1], [], []>} : vector<128x128xbf16>, vector<128x128xbf16>, vector<128x128xf32> -> vector<128x128xf32>
    %5 = vector.broadcast %1 : vector<128x1xf32> to vector<128x128xf32>
    %6 = arith.mulf %4, %5 : vector<128x128xf32>
    %7 = arith.truncf %6 : vector<128x128xf32> to vector<128x128xbf16>
    %cst_7 = arith.constant dense<0.000000e+00> : vector<128x128xf32>
    %8 = tpu.matmul %0, %7, %cst_7 {dimension_numbers = #tpu.dot_dimension_numbers<[1], [0], [0], [1], [0, 0, 1, 1], [], []>} : vector<128x128xbf16>, vector<128x128xbf16>, vector<128x128xf32> -> vector<128x128xf32>
    %9 = vector.broadcast %1 : vector<128x1xf32> to vector<128x128xf32>
    %10 = arith.mulf %8, %9 : vector<128x128xf32>
    %c0_8 = arith.constant 0 : index
    %c0_9 = arith.constant 0 : index
    %11 = vector.load %arg4[%c0_8, %c0_9] : memref<1x128xf32, #tpu.memory_space<vmem>>, vector<1x128xf32>
    %12 = vector.broadcast %11 : vector<1x128xf32> to vector<128x128xf32>
    %13 = arith.addf %10, %12 : vector<128x128xf32>
    %cst_10 = arith.constant 0.000000e+00 : f32
    %14 = vector.broadcast %cst_10 : f32 to vector<128x128xf32>
    %15 = arith.maximumf %13, %14 : vector<128x128xf32>
    %16 = arith.truncf %15 : vector<128x128xf32> to vector<128x128xbf16>
    %c0_11 = arith.constant 0 : index
    %c0_12 = arith.constant 0 : index
    %17 = vector.load %arg5[%c0_11, %c0_12] : memref<128x128xbf16, #tpu.memory_space<vmem>>, vector<128x128xbf16>
    %cst_13 = arith.constant dense<0.000000e+00> : vector<128x128xf32>
    %18 = tpu.matmul %16, %17, %cst_13 {dimension_numbers = #tpu.dot_dimension_numbers<[1], [0], [0], [1], [0, 0, 1, 1], [], []>} : vector<128x128xbf16>, vector<128x128xbf16>, vector<128x128xf32> -> vector<128x128xf32>
    %19 = vector.broadcast %1 : vector<128x1xf32> to vector<128x128xf32>
    %20 = arith.mulf %18, %19 : vector<128x128xf32>
    %21 = arith.truncf %20 : vector<128x128xf32> to vector<128x128xbf16>
    %cst_14 = arith.constant dense<0.000000e+00> : vector<128x128xf32>
    %22 = tpu.matmul %0, %21, %cst_14 {dimension_numbers = #tpu.dot_dimension_numbers<[1], [0], [0], [1], [0, 0, 1, 1], [], []>} : vector<128x128xbf16>, vector<128x128xbf16>, vector<128x128xf32> -> vector<128x128xf32>
    %23 = vector.broadcast %1 : vector<128x1xf32> to vector<128x128xf32>
    %24 = arith.mulf %22, %23 : vector<128x128xf32>
    %c0_15 = arith.constant 0 : index
    %c0_16 = arith.constant 0 : index
    %25 = vector.load %arg6[%c0_15, %c0_16] : memref<1x128xf32, #tpu.memory_space<vmem>>, vector<1x128xf32>
    %26 = vector.broadcast %25 : vector<1x128xf32> to vector<128x128xf32>
    %27 = arith.addf %24, %26 : vector<128x128xf32>
    %cst_17 = arith.constant 0.000000e+00 : f32
    %28 = vector.broadcast %cst_17 : f32 to vector<128x128xf32>
    %29 = arith.maximumf %27, %28 : vector<128x128xf32>
    %30 = arith.truncf %29 : vector<128x128xf32> to vector<128x128xbf16>
    %c0_18 = arith.constant 0 : index
    %c0_19 = arith.constant 0 : index
    %31 = vector.load %arg7[%c0_18, %c0_19] : memref<128x128xbf16, #tpu.memory_space<vmem>>, vector<128x128xbf16>
    %cst_20 = arith.constant dense<0.000000e+00> : vector<128x128xf32>
    %32 = tpu.matmul %30, %31, %cst_20 {dimension_numbers = #tpu.dot_dimension_numbers<[1], [0], [0], [1], [0, 0, 1, 1], [], []>} : vector<128x128xbf16>, vector<128x128xbf16>, vector<128x128xf32> -> vector<128x128xf32>
    %33 = vector.broadcast %1 : vector<128x1xf32> to vector<128x128xf32>
    %34 = arith.mulf %32, %33 : vector<128x128xf32>
    %35 = arith.truncf %34 : vector<128x128xf32> to vector<128x128xbf16>
    %cst_21 = arith.constant dense<0.000000e+00> : vector<128x128xf32>
    %36 = tpu.matmul %0, %35, %cst_21 {dimension_numbers = #tpu.dot_dimension_numbers<[1], [0], [0], [1], [0, 0, 1, 1], [], []>} : vector<128x128xbf16>, vector<128x128xbf16>, vector<128x128xf32> -> vector<128x128xf32>
    %37 = vector.broadcast %1 : vector<128x1xf32> to vector<128x128xf32>
    %38 = arith.mulf %36, %37 : vector<128x128xf32>
    %c0_22 = arith.constant 0 : index
    %c0_23 = arith.constant 0 : index
    %39 = vector.load %arg8[%c0_22, %c0_23] : memref<1x128xf32, #tpu.memory_space<vmem>>, vector<1x128xf32>
    %40 = vector.broadcast %39 : vector<1x128xf32> to vector<128x128xf32>
    %41 = arith.addf %38, %40 : vector<128x128xf32>
    %c0_24 = arith.constant 0 : index
    %c0_25 = arith.constant 0 : index
    %42 = vector.load %arg9[%c0_24, %c0_25] : memref<128x128xf32, #tpu.memory_space<vmem>>, vector<128x128xf32>
    tpu.vector_store %arg9[%c0_24, %c0_25], %41 {strides = array<i32>} : memref<128x128xf32, #tpu.memory_space<vmem>>, vector<128x128xf32>,
    return
  }
}

</mosaic_0001>

<bundles_post_ra>
// kernel: tpu_custom_call.1
= control target key start
LH: loop header
LB: loop body
LE: loop exit
PB: predicated region body
PF: predicated region fallthrough
CT: control target
= control target key end

     0   :  { %14 = vsyncpa [#allocation3], 0  ;;  %s2270_s0 = inlined_call_operand.vmem [shape: bf16[128,128], index: 0, kind: input, shape index: {}]   ;;  %s2271_s1 = inlined_call_operand.vmem [shape: f32[128,1], index: 1, kind: input, shape index: {}]   ;;  %s2272_s2 = inlined_call_operand.vmem [shape: bf16[128,128], index: 2, kind: input, shape index: {}]   ;;  %s2273_s3 = inlined_call_operand.hbm [shape: bf16[128,128], index: 3, kind: input, shape index: {}]   ;;  %s2274_s4 = inlined_call_operand.vmem [shape: f32[1,128], index: 4, kind: input, shape index: {}]   ;;  %s2275_s5 = inlined_call_operand.hbm [shape: bf16[128,128], index: 5, kind: input, shape index: {}]   ;;  %s2276_s6 = inlined_call_operand.vmem [shape: f32[1,128], index: 6, kind: input, shape index: {}]   ;;  %s2277_s7 = inlined_call_operand.hbm [shape: bf16[128,128], index: 7, kind: input, shape index: {}]   ;;  %s2278_s8 = inlined_call_operand.vmem [shape: f32[1,128], index: 8, kind: input, shape index: {}]   ;;  %s2279_s9 = inlined_call_operand.hbm [shape: f32[128,128], index: 9, kind: output, shape index: {}]  }
   0x1   :  { %15 = vsyncpa [#allocation6], 0 }
   0x2   :  { %16 = vsyncpa [#allocation4], 0  ;;  %s1820_s30 = smov [#allocation5]   ;;  %s1821_s11 = smov [#allocation2]  }
   0x3   :  { %s42_s10 = sshll.u32 %s1820_s30, 4  ;;  %s28_s12 = sshll.u32 %s1821_s11, 4  ;;  %s43_s10 = int_to_ptr.vmem [resolvable:$true] %s42_s10  ;;  %s1879_s12 = int_to_ptr.vmem [resolvable:$true] %s28_s12 }
   0x4   :  { %s1726_s15 = scalar_lea.hbm %s2275_s5, 1024 }
   0x5   :  { %p1727_p0 = scmp.ne.s32.totalorder %s2275_s5, %s1726_s15  ;;  %p1730_p1 = scmp.lt.u32.totalorder %s1726_s15, %s2275_s5 }
   0x7   :  { %p1732_p2 = pnand %p1730_p1, %p1727_p0 }
   0x9   :  { %1735 = shalt.err (!%p1732_p2)
}
   0xa   :  { %s1736_s20 = scalar_lea.vmem %s43_s10, 1024  ;;  %p1741_p4 = scmp.lt.s32.totalorder %s43_s10, %s43_s10 }
   0xb   :  { %p1737_p3 = scmp.ne.s32.totalorder %s43_s10, %s1736_s20  ;;  %p1742_p5 = scmp.lt.s32.totalorder %s1736_s20, %s1736_s20 }
   0xd   :  { %p1743_p6 = por %p1742_p5, %p1741_p4 }
   0xf   :  { %p1744_p7 = pnand %p1743_p6, %p1737_p3 }
  0x11   :  { %1747 = shalt.err (!%p1744_p7)
}
  0x12   :  { %s1822_s21 = smov 64   ;;  %s1823_s22 = smov 4  }
  0x13   :  { %48 = dma.hbm_to_vmem [thread:$0]  %s2275_s5, 1024, %s43_s10, [#allocation6], %s1822_s21, %s1822_s21, %s1823_s22  }
  0x14   :  { %s1748_s27 = scalar_lea.hbm %s2273_s3, 1024 }
  0x15   :  { %p1749_p8 = scmp.ne.s32.totalorder %s2273_s3, %s1748_s27  ;;  %p1752_p9 = scmp.lt.u32.totalorder %s1748_s27, %s2273_s3 }
  0x17   :  { %p1754_p10 = pnand %p1752_p9, %p1749_p8 }
  0x19   :  { %1757 = shalt.err (!%p1754_p10)
}
  0x1a   :  { %s1758_s13 = scalar_lea.vmem %s1879_s12, 1024  ;;  %p1763_p12 = scmp.lt.s32.totalorder %s1879_s12, %s1879_s12 }
  0x1b   :  { %p1759_p11 = scmp.ne.s32.totalorder %s1879_s12, %s1758_s13  ;;  %p1764_p13 = scmp.lt.s32.totalorder %s1758_s13, %s1758_s13 }
  0x1d   :  { %p1765_p0 = por %p1764_p13, %p1763_p12 }
  0x1f   :  { %p1766_p1 = pnand %p1765_p0, %p1759_p11 }
  0x21   :  { %1769 = shalt.err (!%p1766_p1)
}
  0x22   :  { %34 = dma.hbm_to_vmem [thread:$0]  %s2273_s3, 1024, %s1879_s12, [#allocation3], %s1822_s21, %s1822_s21, %s1823_s22  }
  0x23   :  { %s1824_s14 = smov [#allocation7]   ;;  %s1770_s18 = scalar_lea.hbm %s2277_s7, 1024 }
  0x24   :  { %s56_s15 = sshll.u32 %s1824_s14, 4  ;;  %p1771_p2 = scmp.ne.s32.totalorder %s2277_s7, %s1770_s18  ;;  %s57_s15 = int_to_ptr.vmem [resolvable:$true] %s56_s15 }
  0x25   :  { %p1774_p3 = scmp.lt.u32.totalorder %s1770_s18, %s2277_s7 }
  0x27   :  { %p1776_p4 = pnand %p1774_p3, %p1771_p2 }
  0x29   :  { %1779 = shalt.err (!%p1776_p4)
}
  0x2a   :  { %s1780_s25 = scalar_lea.vmem %s57_s15, 1024  ;;  %p1785_p6 = scmp.lt.s32.totalorder %s57_s15, %s57_s15 }
  0x2b   :  { %p1781_p5 = scmp.ne.s32.totalorder %s57_s15, %s1780_s25  ;;  %p1786_p7 = scmp.lt.s32.totalorder %s1780_s25, %s1780_s25 }
  0x2d   :  { %p1787_p8 = por %p1786_p7, %p1785_p6 }
  0x2f   :  { %p1788_p9 = pnand %p1787_p8, %p1781_p5 }
  0x31   :  { %1791 = shalt.err (!%p1788_p9)
}
  0x32   :  { %62 = dma.hbm_to_vmem [thread:$0]  %s2277_s7, 1024, %s57_s15, [#allocation6], %s1822_s21, %s1822_s21, %s1823_s22  }
  0x33   :  { %1814 = dma.done.wait [#allocation3], 1024  }
  0x34   :  { %1815 = vsyncadd [#allocation3], 4294966272 }
  0x35   :  { %1816 = dma.done.wait [#allocation6], 2048  }
  0x36   :  { %1817 = vsyncadd [#allocation6], 4294965248  ;;  %v1825_v0 = vmov 0   ;;  %v1686_v1 = vld [vmem:[#allocation2] sm:$0xff]   ;;  %v1687_v2 = vld [vmem:[#allocation2 + $0x8] sm:$0xff]  }
  0x37   :  { %1684 = vset.pattern.permute.xlu0 %v1825_v0  ;;  %1685 = vset.pattern.permute.xlu1 %v1825_v0  ;;  %v1688_v3 = vld [vmem:[#allocation2 + $0x10] sm:$0xff]   ;;  %v1689_v4 = vld [vmem:[#allocation2 + $0x18] sm:$0xff]   ;;  %v1694_v5 = vld [vmem:[%s2272_s2] sm:$0xff]  }
  0x38   :  { %1483 = vmatprep.subr.bf16.mxu0 %v1686_v1  ;;  %1499 = vmatprep.mubr.bf16.mxu0 %v1694_v5  ;;  %v1690_v6 = vld [vmem:[#allocation2 + $0x20] sm:$0xff]   ;;  %v1691_v7 = vld [vmem:[#allocation2 + $0x28] sm:$0xff]   ;;  %v93_v9 = vld [vmem:[%s2271_s1 + $0x10] sm:$0xff] }
  0x39   :  { %1484 = vmatpush3.bf16.msra.mxu0 %v1686_v1  ;;  %v91_v8 = vld [vmem:[%s2271_s1] sm:$0xff]  ;;  %344 = vperm.xlu1 %1685, %v93_v9   ;;  %v92_v10 = vld [vmem:[%s2271_s1 + $0x8] sm:$0xff]  ;;  %v94_v11 = vld [vmem:[%s2271_s1 + $0x18] sm:$0xff] }
  0x3a   :  { %1485 = vmatprep.subr.bf16.mxu0 %v1687_v2  ;;  %334 = vperm.xlu0 %1684, %v91_v8   ;;  %v1692_v12 = vld [vmem:[#allocation2 + $0x30] sm:$0xff]   ;;  %v95_v13 = vld [vmem:[%s2271_s1 + $0x20] sm:$0xff]  ;;  %v96_v14 = vld [vmem:[%s2271_s1 + $0x28] sm:$0xff] }
  0x3b   :  { %v1693_v15 = vld [vmem:[#allocation2 + $0x38] sm:$0xff]   ;;  %v97_v16 = vld [vmem:[%s2271_s1 + $0x30] sm:$0xff]  ;;  %v1695_v18 = vld [vmem:[%s2272_s2 + $0x8] sm:$0xff]  }
  0x3c   :  { %v98_v17 = vld [vmem:[%s2271_s1 + $0x38] sm:$0xff]  ;;  %v99_v19 = vld [vmem:[%s2271_s1 + $0x40] sm:$0xff]  ;;  %v100_v20 = vld [vmem:[%s2271_s1 + $0x48] sm:$0xff] }
  0x3d   :  { %1486 = vmatpush3.bf16.msra.mxu0 %v1687_v2  ;;  %349 = vperm.xlu1 %1685, %v94_v11   ;;  %v1696_v21 = vld [vmem:[%s2272_s2 + $0x10] sm:$0xff]   ;;  %v102_v23 = vld [vmem:[%s2271_s1 + $0x58] sm:$0xff]  ;;  %v103_v25 = vld [vmem:[%s2271_s1 + $0x60] sm:$0xff] }
  0x3e   :  { %1487 = vmatprep.subr.bf16.mxu0 %v1688_v3  ;;  %339 = vperm.xlu0 %1684, %v92_v10   ;;  %v101_v22 = vld [vmem:[%s2271_s1 + $0x50] sm:$0xff]  ;;  %v1697_v24 = vld [vmem:[%s2272_s2 + $0x18] sm:$0xff]   ;;  %v104_v26 = vld [vmem:[%s2271_s1 + $0x68] sm:$0xff] }
  0x3f   :  { %v1698_v27 = vld [vmem:[%s2272_s2 + $0x20] sm:$0xff]   ;;  %v105_v28 = vld [vmem:[%s2271_s1 + $0x70] sm:$0xff]  ;;  %v106_v29 = vld [vmem:[%s2271_s1 + $0x78] sm:$0xff] }
  0x40   :  { %v1699_v30 = vld [vmem:[%s2272_s2 + $0x28] sm:$0xff]   ;;  %v1700_v31 = vld [vmem:[%s2272_s2 + $0x30] sm:$0xff]   ;;  %v1701_v32 = vld [vmem:[%s2272_s2 + $0x38] sm:$0xff]  }
  0x41   :  { %1488 = vmatpush3.bf16.msra.mxu0 %v1688_v3  ;;  %359 = vperm.xlu1 %1685, %v96_v14   ;;  %v2006_v33 = vld [vmem:[%s2270_s0] sm:$0xff]   ;;  %v1711_v35 = vld [vmem:[#allocation5 + $0x8] sm:$0xff]   ;;  %v1712_v36 = vld [vmem:[#allocation5 + $0x10] sm:$0xff]  }
  0x42   :  { %1489 = vmatprep.subr.bf16.mxu0 %v1689_v4  ;;  %354 = vperm.xlu0 %1684, %v95_v13   ;;  %v1710_v34 = vld [vmem:[#allocation5] sm:$0xff]   ;;  %v1713_v37 = vld [vmem:[#allocation5 + $0x18] sm:$0xff]  }
  0x43   :  { %1531 = vmatprep.mubr.bf16.mxu1 %v2006_v33  ;;  %v1714_v38 = vld [vmem:[#allocation5 + $0x20] sm:$0xff]  }
  0x45   :  { %1490 = vmatpush3.bf16.msra.mxu0 %v1689_v4  ;;  %369 = vperm.xlu1 %1685, %v98_v17  }
  0x46   :  { %1491 = vmatprep.subr.bf16.mxu0 %v1690_v6  ;;  %364 = vperm.xlu0 %1684, %v97_v16  }
  0x49   :  { %1492 = vmatpush3.bf16.msra.mxu0 %v1690_v6  ;;  %379 = vperm.xlu1 %1685, %v100_v20  }
  0x4a   :  { %1493 = vmatprep.subr.bf16.mxu0 %v1691_v7  ;;  %374 = vperm.xlu0 %1684, %v99_v19  }
  0x4d   :  { %1494 = vmatpush3.bf16.msra.mxu0 %v1691_v7  ;;  %389 = vperm.xlu1 %1685, %v102_v23  }
  0x4e   :  { %1495 = vmatprep.subr.bf16.mxu0 %v1692_v12  ;;  %384 = vperm.xlu0 %1684, %v101_v22  }
  0x51   :  { %1496 = vmatpush3.bf16.msra.mxu0 %v1692_v12  ;;  %399 = vperm.xlu1 %1685, %v104_v26  }
  0x52   :  { %1497 = vmatprep.subr.bf16.mxu0 %v1693_v15  ;;  %394 = vperm.xlu0 %1684, %v103_v25  }
  0x55   :  { %1498 = vmatpush3.bf16.msra.mxu0 %v1693_v15  ;;  %409 = vperm.xlu1 %1685, %v106_v29  }
  0x56   :  { %404 = vperm.xlu0 %1684, %v105_v28   ;;  %1547 = vmatprep.subr.bf16.mxu0 %v1710_v34 }
  0x58   :  { %1500 = vmatmul.mubr.bf16.vlgmr.msra.gmra.mrb[0].mxu0 %v1695_v18 }
  0x59   :  { %1503 = vmatprep.mubr.bf16.mxu0 %v1696_v21  ;;  %1548 = vmatpush3.bf16.msra.mxu0 %v1710_v34  ;;  %v2072_v34 = vld [vmem:[%s2270_s0 + $0x18] sm:$0xff]  }
  0x5a   :  { %1549 = vmatprep.subr.bf16.mxu0 %v1711_v35 }
  0x5d   :  { %1550 = vmatpush3.bf16.msra.mxu0 %v1711_v35  ;;  %v2077_v35 = vld [vmem:[%s2270_s0 + $0x20] sm:$0xff]  }
  0x5e   :  { %1551 = vmatprep.subr.bf16.mxu0 %v1712_v36 }
  0x60   :  { %1504 = vmatmul.mubr.bf16.gmra.mrb[4].mxu0 %v1697_v24 }
  0x61   :  { %1507 = vmatprep.mubr.bf16.mxu0 %v1698_v27  ;;  %1552 = vmatpush3.bf16.msra.mxu0 %v1712_v36  ;;  %v2084_v36 = vld [vmem:[%s2270_s0 + $0x28] sm:$0xff]  }
  0x62   :  { %1553 = vmatprep.subr.bf16.mxu0 %v1713_v37 }
  0x65   :  { %1554 = vmatpush3.bf16.msra.mxu0 %v1713_v37  ;;  %v2089_v37 = vld [vmem:[%s2270_s0 + $0x30] sm:$0xff]  }
  0x66   :  { %1555 = vmatprep.subr.bf16.mxu0 %v1714_v38 }
  0x68   :  { %1508 = vmatmul.mubr.bf16.gmra.mrb[8].mxu0 %v1699_v30 }
  0x69   :  { %1511 = vmatprep.mubr.bf16.mxu0 %v1700_v31  ;;  %1556 = vmatpush3.bf16.msra.mxu0 %v1714_v38  ;;  %v2060_v31 = vld [vmem:[%s2270_s0 + $0x8] sm:$0xff]   ;;  %v2096_v38 = vld [vmem:[%s2270_s0 + $0x38] sm:$0xff]  }
  0x70   :  { %1512 = vmatmul.mubr.bf16.gmra.mrb[12].mxu0 %v1701_v32  ;;  %v2065_v32 = vld [vmem:[%s2270_s0 + $0x10] sm:$0xff]  }
  0xb8   :  { %v2011_v40 = vpop.permute.xlu1 %344 }
  0xb9   :  { %v2009_v39 = vpop.permute.xlu0 %334 }
  0xbc   :  { %v2015_v42 = vpop.permute.xlu1 %349 }
  0xbd   :  { %v2013_v41 = vpop.permute.xlu0 %339 }
  0xc0   :  { %v2019_v44 = vpop.permute.xlu1 %359 }
  0xc1   :  { %v2017_v43 = vpop.permute.xlu0 %354 }
  0xc4   :  { %v2023_v48 = vpop.permute.xlu1 %369 }
  0xc5   :  { %v2021_v46 = vpop.permute.xlu0 %364 }
  0xc8   :  { %v2031_v58 = vpop.permute.xlu1 %379 }
  0xc9   :  { %v2029_v57 = vpop.permute.xlu0 %374 }
  0xcc   :  { %v2039_v5 = vpop.permute.xlu1 %389 }
  0xcd   :  { %v2037_v3 = vpop.permute.xlu0 %384 }
  0xd0   :  { %v2045_v14 = vpop.permute.xlu1 %399 }
  0xd1   :  { %v2041_v10 = vpop.permute.xlu0 %394 }
  0xd4   :  { %v2051_v22 = vpop.permute.xlu1 %409 }
  0xd5   :  { %v2049_v20 = vpop.permute.xlu0 %404 }
 0x12b   :  { %v1501_v45 = vpop.f32.mrb[0].mxu0 }
 0x12c   :  { %v269_v47 = vpop.f32.mrb[1].mxu0  ;;  %v414_v50 = vmul.f32 %v1501_v45, %v2011_v40  ;;  %v1715_v45 = vld [vmem:[#allocation5 + $0x28] sm:$0xff]  }
 0x12d   :  { %v1502_v49 = vpop.f32.mrb[2].mxu0  ;;  %v412_v53 = vmul.f32 %v2009_v39, %v269_v47  ;;  %1557 = vmatprep.subr.bf16.mxu0 %v1715_v45  ;;  %v1716_v47 = vld [vmem:[#allocation5 + $0x30] sm:$0xff]  }
 0x12e   :  { %v415_v51 = vmul.f32 %v1502_v49, %v2015_v42  ;;  %v272_v52 = vpop.f32.mrb[3].mxu0  ;;  %1558 = vmatpush3.bf16.msra.mxu0 %v1715_v45  ;;  %v1717_v49 = vld [vmem:[#allocation5 + $0x38] sm:$0xff]  }
 0x12f   :  { %v413_v54 = vmul.f32 %v2013_v41, %v272_v52  ;;  %1559 = vmatprep.subr.bf16.mxu0 %v1716_v47 }
 0x130   :  { %v429_v55 = vpack.c.bf16 %v415_v51, %v414_v50  ;;  %v2103_v51 = vld [vmem:[%s2274_s4] ss:$0 sm:$0xff] }
 0x131   :  { %v428_v56 = vpack.c.bf16 %v413_v54, %v412_v53 }
 0x132   :  { %1560 = vmatpush3.bf16.msra.mxu0 %v1716_v47 }
 0x133   :  { %v1505_v59 = vpop.f32.mrb[4].mxu0  ;;  %1515 = vmatprep.subr.bf16.mxu1 %v428_v56  ;;  %1561 = vmatprep.subr.bf16.mxu0 %v1717_v49 }
 0x134   :  { %v285_v60 = vpop.f32.mrb[5].mxu0  ;;  %1516 = vmatpush3.bf16.msra.mxu1 %v428_v56  ;;  %v418_v62 = vmul.f32 %v1505_v59, %v2021_v46 }
 0x135   :  { %v1506_v61 = vpop.f32.mrb[6].mxu0  ;;  %1517 = vmatprep.subr.bf16.mxu1 %v429_v55  ;;  %v416_v1 = vmul.f32 %v2017_v43, %v285_v60 }
 0x136   :  { %v419_v63 = vmul.f32 %v1506_v61, %v2023_v48  ;;  %v288_v0 = vpop.f32.mrb[7].mxu0  ;;  %1562 = vmatpush3.bf16.msra.mxu0 %v1717_v49 }
 0x137   :  { %v417_v2 = vmul.f32 %v2019_v44, %v288_v0 }
 0x138   :  { %v431_v4 = vpack.c.bf16 %v419_v63, %v418_v62  ;;  %1518 = vmatpush3.bf16.msra.mxu1 %v429_v55 }
 0x139   :  { %v430_v6 = vpack.c.bf16 %v417_v2, %v416_v1 }
 0x13b   :  { %v1509_v7 = vpop.f32.mrb[8].mxu0  ;;  %1519 = vmatprep.subr.bf16.mxu1 %v430_v6 }
 0x13c   :  { %v301_v8 = vpop.f32.mrb[9].mxu0  ;;  %1520 = vmatpush3.bf16.msra.mxu1 %v430_v6  ;;  %v422_v11 = vmul.f32 %v1509_v7, %v2037_v3 }
 0x13d   :  { %v1510_v9 = vpop.f32.mrb[10].mxu0  ;;  %1521 = vmatprep.subr.bf16.mxu1 %v431_v4  ;;  %v420_v15 = vmul.f32 %v2029_v57, %v301_v8 }
 0x13e   :  { %v423_v12 = vmul.f32 %v1510_v9, %v2039_v5  ;;  %v304_v13 = vpop.f32.mrb[11].mxu0 }
 0x13f   :  { %v421_v16 = vmul.f32 %v2031_v58, %v304_v13 }
 0x140   :  { %v433_v17 = vpack.c.bf16 %v423_v12, %v422_v11  ;;  %1522 = vmatpush3.bf16.msra.mxu1 %v431_v4 }
 0x141   :  { %v432_v18 = vpack.c.bf16 %v421_v16, %v420_v15 }
 0x143   :  { %v1513_v19 = vpop.f32.mrb[12].mxu0  ;;  %1523 = vmatprep.subr.bf16.mxu1 %v432_v18 }
 0x144   :  { %v317_v21 = vpop.f32.mrb[13].mxu0  ;;  %1524 = vmatpush3.bf16.msra.mxu1 %v432_v18  ;;  %v426_v24 = vmul.f32 %v1513_v19, %v2049_v20 }
 0x145   :  { %v1514_v23 = vpop.f32.mrb[14].mxu0  ;;  %1525 = vmatprep.subr.bf16.mxu1 %v433_v17  ;;  %v424_v27 = vmul.f32 %v2041_v10, %v317_v21 }
 0x146   :  { %v427_v25 = vmul.f32 %v1514_v23, %v2051_v22  ;;  %v320_v26 = vpop.f32.mrb[15].mxu0 }
 0x147   :  { %v425_v28 = vmul.f32 %v2045_v14, %v320_v26 }
 0x148   :  { %v435_v29 = vpack.c.bf16 %v427_v25, %v426_v24  ;;  %1526 = vmatpush3.bf16.msra.mxu1 %v433_v17 }
 0x149   :  { %v434_v30 = vpack.c.bf16 %v425_v28, %v424_v27 }
 0x14b   :  { %1527 = vmatprep.subr.bf16.mxu1 %v434_v30 }
 0x14c   :  { %1528 = vmatpush3.bf16.msra.mxu1 %v434_v30 }
 0x14d   :  { %1529 = vmatprep.subr.bf16.mxu1 %v435_v29 }
 0x150   :  { %1530 = vmatpush3.bf16.msra.mxu1 %v435_v29 }
 0x153   :  { %1532 = vmatmul.mubr.bf16.vlgmr.msra.gmra.mrb[0].mxu1 %v2060_v31 }
 0x154   :  { %1535 = vmatprep.mubr.bf16.mxu1 %v2065_v32 }
 0x15b   :  { %1536 = vmatmul.mubr.bf16.gmra.mrb[4].mxu1 %v2072_v34 }
 0x15c   :  { %1539 = vmatprep.mubr.bf16.mxu1 %v2077_v35 }
 0x163   :  { %1540 = vmatmul.mubr.bf16.gmra.mrb[8].mxu1 %v2084_v36 }
 0x164   :  { %1543 = vmatprep.mubr.bf16.mxu1 %v2089_v37 }
 0x16b   :  { %1544 = vmatmul.mubr.bf16.gmra.mrb[12].mxu1 %v2096_v38 }
 0x16c   :  { %1595 = vmatprep.mubr.bf16.mxu1 %v2006_v33 }
 0x226   :  { %v1533_v50 = vpop.f32.mrb[0].mxu1 }
 0x227   :  { %v583_v52 = vmul.f32 %v1533_v50, %v2011_v40  ;;  %v518_v53 = vpop.f32.mrb[1].mxu1 }
 0x228   :  { %v581_v54 = vmul.f32 %v518_v53, %v2009_v39  ;;  %v1534_v55 = vpop.f32.mrb[2].mxu1 }
 0x229   :  { %v606_v56 = vadd.f32 %v2103_v51, %v583_v52  ;;  %v584_v59 = vmul.f32 %v1534_v55, %v2015_v42  ;;  %v521_v60 = vpop.f32.mrb[3].mxu1 }
 0x22a   :  { %v604_v61 = vadd.f32 %v2103_v51, %v581_v54  ;;  %v582_v62 = vmul.f32 %v521_v60, %v2013_v41 }
 0x22b   :  { %v607_v63 = vadd.f32 %v2103_v51, %v584_v59  ;;  %v622_v1 = vmax.f32 %v606_v56, 0.0 }
 0x22c   :  { %v605_v0 = vadd.f32 %v2103_v51, %v582_v62  ;;  %v620_v4 = vmax.f32 %v604_v61, 0.0 }
 0x22d   :  { %v623_v2 = vmax.f32 %v607_v63, 0.0 }
 0x22e   :  { %v621_v6 = vmax.f32 %v605_v0, 0.0  ;;  %v1537_v7 = vpop.f32.mrb[4].mxu1 }
 0x22f   :  { %v637_v8 = vpack.c.bf16 %v623_v2, %v622_v1  ;;  %v587_v9 = vmul.f32 %v1537_v7, %v2021_v46  ;;  %v534_v11 = vpop.f32.mrb[5].mxu1 }
 0x230   :  { %v585_v12 = vmul.f32 %v534_v11, %v2017_v43  ;;  %v1538_v13 = vpop.f32.mrb[6].mxu1  ;;  %v636_v15 = vpack.c.bf16 %v621_v6, %v620_v4 }
 0x231   :  { %v610_v16 = vadd.f32 %v2103_v51, %v587_v9  ;;  %v588_v17 = vmul.f32 %v1538_v13, %v2023_v48  ;;  %v537_v18 = vpop.f32.mrb[7].mxu1 }
 0x232   :  { %v608_v19 = vadd.f32 %v2103_v51, %v585_v12  ;;  %v586_v21 = vmul.f32 %v537_v18, %v2019_v44  ;;  %1563 = vmatprep.mubr.bf16.mxu0 %v636_v15 }
 0x233   :  { %v611_v23 = vadd.f32 %v2103_v51, %v588_v17  ;;  %1564 = vmatmul.mubr.bf16.vlgmr.msra.gmra.mrb[16].mxu0 %v637_v8  ;;  %v626_v25 = vmax.f32 %v610_v16, 0.0 }
 0x234   :  { %v609_v24 = vadd.f32 %v2103_v51, %v586_v21  ;;  %v624_v27 = vmax.f32 %v608_v19, 0.0 }
 0x235   :  { %v627_v26 = vmax.f32 %v611_v23, 0.0 }
 0x236   :  { %v625_v28 = vmax.f32 %v609_v24, 0.0  ;;  %v1541_v29 = vpop.f32.mrb[8].mxu1 }
 0x237   :  { %v591_v30 = vmul.f32 %v1541_v29, %v2037_v3  ;;  %v550_v45 = vpop.f32.mrb[9].mxu1  ;;  %v639_v47 = vpack.c.bf16 %v627_v26, %v626_v25  ;;  %v1719_v29 = vld [vmem:[#allocation7 + $0x8] sm:$0xff]  }
 0x238   :  { %v589_v49 = vmul.f32 %v550_v45, %v2029_v57  ;;  %v1542_v50 = vpop.f32.mrb[10].mxu1  ;;  %v638_v52 = vpack.c.bf16 %v625_v28, %v624_v27  ;;  %v1718_v28 = vld [vmem:[#allocation7] sm:$0xff]   ;;  %v1721_v45 = vld [vmem:[#allocation7 + $0x18] sm:$0xff]  }
 0x239   :  { %v614_v53 = vadd.f32 %v2103_v51, %v591_v30  ;;  %v592_v54 = vmul.f32 %v1542_v50, %v2039_v5  ;;  %v553_v55 = vpop.f32.mrb[11].mxu1  ;;  %1611 = vmatprep.subr.bf16.mxu0 %v1718_v28  ;;  %v1720_v30 = vld [vmem:[#allocation7 + $0x10] sm:$0xff]  }
 0x23a   :  { %v612_v56 = vadd.f32 %v2103_v51, %v589_v49  ;;  %v590_v59 = vmul.f32 %v553_v55, %v2031_v58  ;;  %1567 = vmatprep.mubr.bf16.mxu0 %v638_v52  ;;  %1612 = vmatpush3.bf16.msra.mxu0 %v1718_v28 }
 0x23b   :  { %v615_v60 = vadd.f32 %v2103_v51, %v592_v54  ;;  %1568 = vmatmul.mubr.bf16.gmra.mrb[20].mxu0 %v639_v47  ;;  %v630_v62 = vmax.f32 %v614_v53, 0.0  ;;  %1613 = vmatprep.subr.bf16.mxu0 %v1719_v29 }
 0x23c   :  { %v613_v61 = vadd.f32 %v2103_v51, %v590_v59  ;;  %v628_v0 = vmax.f32 %v612_v56, 0.0 }
 0x23d   :  { %v631_v63 = vmax.f32 %v615_v60, 0.0 }
 0x23e   :  { %v629_v1 = vmax.f32 %v613_v61, 0.0  ;;  %v1545_v2 = vpop.f32.mrb[12].mxu1  ;;  %1614 = vmatpush3.bf16.msra.mxu0 %v1719_v29 }
 0x23f   :  { %v595_v4 = vmul.f32 %v1545_v2, %v2049_v20  ;;  %v566_v6 = vpop.f32.mrb[13].mxu1  ;;  %v641_v7 = vpack.c.bf16 %v631_v63, %v630_v62  ;;  %1615 = vmatprep.subr.bf16.mxu0 %v1720_v30 }
 0x240   :  { %v593_v8 = vmul.f32 %v566_v6, %v2041_v10  ;;  %v1546_v9 = vpop.f32.mrb[14].mxu1  ;;  %v640_v11 = vpack.c.bf16 %v629_v1, %v628_v0 }
 0x241   :  { %v618_v12 = vadd.f32 %v2103_v51, %v595_v4  ;;  %v596_v13 = vmul.f32 %v1546_v9, %v2051_v22  ;;  %v569_v15 = vpop.f32.mrb[15].mxu1 }
 0x242   :  { %v616_v16 = vadd.f32 %v2103_v51, %v593_v8  ;;  %v594_v17 = vmul.f32 %v569_v15, %v2045_v14  ;;  %1571 = vmatprep.mubr.bf16.mxu0 %v640_v11  ;;  %1616 = vmatpush3.bf16.msra.mxu0 %v1720_v30 }
 0x243   :  { %v619_v18 = vadd.f32 %v2103_v51, %v596_v13  ;;  %1572 = vmatmul.mubr.bf16.gmra.mrb[24].mxu0 %v641_v7  ;;  %v634_v21 = vmax.f32 %v618_v12, 0.0  ;;  %1617 = vmatprep.subr.bf16.mxu0 %v1721_v45 }
 0x244   :  { %v617_v19 = vadd.f32 %v2103_v51, %v594_v17  ;;  %v632_v24 = vmax.f32 %v616_v16, 0.0  ;;  %v1722_v51 = vld [vmem:[#allocation7 + $0x20] sm:$0xff]  }
 0x245   :  { %v635_v23 = vmax.f32 %v619_v18, 0.0 }
 0x246   :  { %v633_v25 = vmax.f32 %v617_v19, 0.0  ;;  %1618 = vmatpush3.bf16.msra.mxu0 %v1721_v45 }
 0x247   :  { %v643_v26 = vpack.c.bf16 %v635_v23, %v634_v21  ;;  %1619 = vmatprep.subr.bf16.mxu0 %v1722_v51 }
 0x248   :  { %v642_v27 = vpack.c.bf16 %v633_v25, %v632_v24 }
 0x24a   :  { %1575 = vmatprep.mubr.bf16.mxu0 %v642_v27  ;;  %1620 = vmatpush3.bf16.msra.mxu0 %v1722_v51 }
 0x24b   :  { %1576 = vmatmul.mubr.bf16.gmra.mrb[28].mxu0 %v643_v26 }
 0x306   :  { %v1565_v47 = vpop.f32.mrb[16].mxu0 }
 0x307   :  { %v742_v49 = vpop.f32.mrb[17].mxu0  ;;  %v807_v52 = vmul.f32 %v1565_v47, %v2011_v40  ;;  %v1723_v47 = vld [vmem:[#allocation7 + $0x28] sm:$0xff]  }
 0x308   :  { %v1566_v50 = vpop.f32.mrb[18].mxu0  ;;  %v805_v55 = vmul.f32 %v742_v49, %v2009_v39  ;;  %1621 = vmatprep.subr.bf16.mxu0 %v1723_v47  ;;  %v1724_v49 = vld [vmem:[#allocation7 + $0x30] sm:$0xff]  }
 0x309   :  { %v808_v53 = vmul.f32 %v1566_v50, %v2015_v42  ;;  %v745_v54 = vpop.f32.mrb[19].mxu0  ;;  %1622 = vmatpush3.bf16.msra.mxu0 %v1723_v47  ;;  %v1725_v50 = vld [vmem:[#allocation7 + $0x38] sm:$0xff]  }
 0x30a   :  { %v806_v56 = vmul.f32 %v745_v54, %v2013_v41  ;;  %1623 = vmatprep.subr.bf16.mxu0 %v1724_v49 }
 0x30b   :  { %v822_v59 = vpack.c.bf16 %v808_v53, %v807_v52  ;;  %v2164_v53 = vld [vmem:[%s2276_s6] ss:$0 sm:$0xff] }
 0x30c   :  { %v821_v60 = vpack.c.bf16 %v806_v56, %v805_v55 }
 0x30d   :  { %1624 = vmatpush3.bf16.msra.mxu0 %v1724_v49 }
 0x30e   :  { %v1569_v61 = vpop.f32.mrb[20].mxu0  ;;  %1579 = vmatprep.subr.bf16.mxu1 %v821_v60  ;;  %1625 = vmatprep.subr.bf16.mxu0 %v1725_v50 }
 0x30f   :  { %v758_v62 = vpop.f32.mrb[21].mxu0  ;;  %1580 = vmatpush3.bf16.msra.mxu1 %v821_v60  ;;  %v811_v0 = vmul.f32 %v1569_v61, %v2021_v46 }
 0x310   :  { %v1570_v63 = vpop.f32.mrb[22].mxu0  ;;  %1581 = vmatprep.subr.bf16.mxu1 %v822_v59  ;;  %v809_v4 = vmul.f32 %v758_v62, %v2017_v43 }
 0x311   :  { %v812_v1 = vmul.f32 %v1570_v63, %v2023_v48  ;;  %v761_v2 = vpop.f32.mrb[23].mxu0  ;;  %1626 = vmatpush3.bf16.msra.mxu0 %v1725_v50 }
 0x312   :  { %v810_v6 = vmul.f32 %v761_v2, %v2019_v44 }
 0x313   :  { %v824_v7 = vpack.c.bf16 %v812_v1, %v811_v0  ;;  %1582 = vmatpush3.bf16.msra.mxu1 %v822_v59 }
 0x314   :  { %v823_v8 = vpack.c.bf16 %v810_v6, %v809_v4 }
 0x316   :  { %v1573_v9 = vpop.f32.mrb[24].mxu0  ;;  %1583 = vmatprep.subr.bf16.mxu1 %v823_v8 }
 0x317   :  { %v774_v11 = vpop.f32.mrb[25].mxu0  ;;  %1584 = vmatpush3.bf16.msra.mxu1 %v823_v8  ;;  %v815_v13 = vmul.f32 %v1573_v9, %v2037_v3 }
 0x318   :  { %v1574_v12 = vpop.f32.mrb[26].mxu0  ;;  %1585 = vmatprep.subr.bf16.mxu1 %v824_v7  ;;  %v813_v17 = vmul.f32 %v774_v11, %v2029_v57 }
 0x319   :  { %v816_v15 = vmul.f32 %v1574_v12, %v2039_v5  ;;  %v777_v16 = vpop.f32.mrb[27].mxu0 }
 0x31a   :  { %v814_v18 = vmul.f32 %v777_v16, %v2031_v58 }
 0x31b   :  { %v826_v19 = vpack.c.bf16 %v816_v15, %v815_v13  ;;  %1586 = vmatpush3.bf16.msra.mxu1 %v824_v7 }
 0x31c   :  { %v825_v21 = vpack.c.bf16 %v814_v18, %v813_v17 }
 0x31e   :  { %v1577_v23 = vpop.f32.mrb[28].mxu0  ;;  %1587 = vmatprep.subr.bf16.mxu1 %v825_v21 }
 0x31f   :  { %v790_v24 = vpop.f32.mrb[29].mxu0  ;;  %1588 = vmatpush3.bf16.msra.mxu1 %v825_v21  ;;  %v819_v26 = vmul.f32 %v1577_v23, %v2049_v20 }
 0x320   :  { %v1578_v25 = vpop.f32.mrb[30].mxu0  ;;  %1589 = vmatprep.subr.bf16.mxu1 %v826_v19  ;;  %v817_v29 = vmul.f32 %v790_v24, %v2041_v10 }
 0x321   :  { %v820_v27 = vmul.f32 %v1578_v25, %v2051_v22  ;;  %v793_v28 = vpop.f32.mrb[31].mxu0 }
 0x322   :  { %v818_v30 = vmul.f32 %v793_v28, %v2045_v14 }
 0x323   :  { %v828_v45 = vpack.c.bf16 %v820_v27, %v819_v26  ;;  %1590 = vmatpush3.bf16.msra.mxu1 %v826_v19 }
 0x324   :  { %v827_v51 = vpack.c.bf16 %v818_v30, %v817_v29 }
 0x326   :  { %1591 = vmatprep.subr.bf16.mxu1 %v827_v51 }
 0x327   :  { %1592 = vmatpush3.bf16.msra.mxu1 %v827_v51 }
 0x328   :  { %1593 = vmatprep.subr.bf16.mxu1 %v828_v45 }
 0x32b   :  { %1594 = vmatpush3.bf16.msra.mxu1 %v828_v45 }
 0x32e   :  { %1596 = vmatmul.mubr.bf16.vlgmr.msra.gmra.mrb[16].mxu1 %v2060_v31 }
 0x32f   :  { %1599 = vmatprep.mubr.bf16.mxu1 %v2065_v32 }
 0x336   :  { %1600 = vmatmul.mubr.bf16.gmra.mrb[20].mxu1 %v2072_v34 }
 0x337   :  { %1603 = vmatprep.mubr.bf16.mxu1 %v2077_v35 }
 0x33e   :  { %1604 = vmatmul.mubr.bf16.gmra.mrb[24].mxu1 %v2084_v36 }
 0x33f   :  { %1607 = vmatprep.mubr.bf16.mxu1 %v2089_v37 }
 0x346   :  { %1608 = vmatmul.mubr.bf16.gmra.mrb[28].mxu1 %v2096_v38 }
 0x347   :  { %1659 = vmatprep.mubr.bf16.mxu1 %v2006_v33 }
 0x401   :  { %v1597_v52 = vpop.f32.mrb[16].mxu1 }
 0x402   :  { %v928_v54 = vmul.f32 %v1597_v52, %v2011_v40  ;;  %v863_v55 = vpop.f32.mrb[17].mxu1 }
 0x403   :  { %v926_v33 = vmul.f32 %v863_v55, %v2009_v39  ;;  %v1598_v56 = vpop.f32.mrb[18].mxu1 }
 0x404   :  { %v951_v59 = vadd.f32 %v2164_v53, %v928_v54  ;;  %v929_v60 = vmul.f32 %v1598_v56, %v2015_v42  ;;  %v866_v61 = vpop.f32.mrb[19].mxu1 }
 0x405   :  { %v949_v62 = vadd.f32 %v2164_v53, %v926_v33  ;;  %v927_v63 = vmul.f32 %v866_v61, %v2013_v41 }
 0x406   :  { %v952_v0 = vadd.f32 %v2164_v53, %v929_v60  ;;  %v967_v2 = vmax.f32 %v951_v59, 0.0 }
 0x407   :  { %v950_v1 = vadd.f32 %v2164_v53, %v927_v63  ;;  %v965_v6 = vmax.f32 %v949_v62, 0.0 }
 0x408   :  { %v968_v4 = vmax.f32 %v952_v0, 0.0 }
 0x409   :  { %v966_v7 = vmax.f32 %v950_v1, 0.0  ;;  %v1601_v8 = vpop.f32.mrb[20].mxu1 }
 0x40a   :  { %v982_v9 = vpack.c.bf16 %v968_v4, %v967_v2  ;;  %v932_v11 = vmul.f32 %v1601_v8, %v2021_v46  ;;  %v879_v12 = vpop.f32.mrb[21].mxu1 }
 0x40b   :  { %v930_v13 = vmul.f32 %v879_v12, %v2017_v43  ;;  %v1602_v15 = vpop.f32.mrb[22].mxu1  ;;  %v981_v16 = vpack.c.bf16 %v966_v7, %v965_v6 }
 0x40c   :  { %v955_v17 = vadd.f32 %v2164_v53, %v932_v11  ;;  %v933_v18 = vmul.f32 %v1602_v15, %v2023_v48  ;;  %v882_v19 = vpop.f32.mrb[23].mxu1 }
 0x40d   :  { %v953_v21 = vadd.f32 %v2164_v53, %v930_v13  ;;  %v931_v23 = vmul.f32 %v882_v19, %v2019_v44  ;;  %1627 = vmatprep.mubr.bf16.mxu0 %v981_v16 }
 0x40e   :  { %v956_v24 = vadd.f32 %v2164_v53, %v933_v18  ;;  %1628 = vmatmul.mubr.bf16.vlgmr.msra.gmra.mrb[32].mxu0 %v982_v9  ;;  %v971_v26 = vmax.f32 %v955_v17, 0.0 }
 0x40f   :  { %v954_v25 = vadd.f32 %v2164_v53, %v931_v23  ;;  %v969_v28 = vmax.f32 %v953_v21, 0.0 }
 0x410   :  { %v972_v27 = vmax.f32 %v956_v24, 0.0 }
 0x411   :  { %v970_v29 = vmax.f32 %v954_v25, 0.0  ;;  %v1605_v30 = vpop.f32.mrb[24].mxu1 }
 0x412   :  { %v936_v45 = vmul.f32 %v1605_v30, %v2037_v3  ;;  %v895_v51 = vpop.f32.mrb[25].mxu1  ;;  %v984_v47 = vpack.c.bf16 %v972_v27, %v971_v26 }
 0x413   :  { %v934_v49 = vmul.f32 %v895_v51, %v2029_v57  ;;  %v1606_v50 = vpop.f32.mrb[26].mxu1  ;;  %v983_v52 = vpack.c.bf16 %v970_v29, %v969_v28 }
 0x414   :  { %v959_v54 = vadd.f32 %v2164_v53, %v936_v45  ;;  %v937_v55 = vmul.f32 %v1606_v50, %v2039_v5  ;;  %v898_v33 = vpop.f32.mrb[27].mxu1 }
 0x415   :  { %v957_v56 = vadd.f32 %v2164_v53, %v934_v49  ;;  %v935_v59 = vmul.f32 %v898_v33, %v2031_v58  ;;  %1631 = vmatprep.mubr.bf16.mxu0 %v983_v52 }
 0x416   :  { %v960_v60 = vadd.f32 %v2164_v53, %v937_v55  ;;  %1632 = vmatmul.mubr.bf16.gmra.mrb[36].mxu0 %v984_v47  ;;  %v975_v62 = vmax.f32 %v959_v54, 0.0 }
 0x417   :  { %v958_v61 = vadd.f32 %v2164_v53, %v935_v59  ;;  %v973_v0 = vmax.f32 %v957_v56, 0.0 }
 0x418   :  { %v976_v63 = vmax.f32 %v960_v60, 0.0 }
 0x419   :  { %v974_v1 = vmax.f32 %v958_v61, 0.0  ;;  %v1609_v2 = vpop.f32.mrb[28].mxu1 }
 0x41a   :  { %v940_v4 = vmul.f32 %v1609_v2, %v2049_v20  ;;  %v911_v6 = vpop.f32.mrb[29].mxu1  ;;  %v986_v7 = vpack.c.bf16 %v976_v63, %v975_v62 }
 0x41b   :  { %v938_v8 = vmul.f32 %v911_v6, %v2041_v10  ;;  %v1610_v9 = vpop.f32.mrb[30].mxu1  ;;  %v985_v11 = vpack.c.bf16 %v974_v1, %v973_v0 }
 0x41c   :  { %v963_v12 = vadd.f32 %v2164_v53, %v940_v4  ;;  %v941_v13 = vmul.f32 %v1610_v9, %v2051_v22  ;;  %v914_v15 = vpop.f32.mrb[31].mxu1 }
 0x41d   :  { %v961_v16 = vadd.f32 %v2164_v53, %v938_v8  ;;  %v939_v17 = vmul.f32 %v914_v15, %v2045_v14  ;;  %1635 = vmatprep.mubr.bf16.mxu0 %v985_v11 }
 0x41e   :  { %v964_v18 = vadd.f32 %v2164_v53, %v941_v13  ;;  %1636 = vmatmul.mubr.bf16.gmra.mrb[40].mxu0 %v986_v7  ;;  %v979_v21 = vmax.f32 %v963_v12, 0.0 }
 0x41f   :  { %v962_v19 = vadd.f32 %v2164_v53, %v939_v17  ;;  %v977_v24 = vmax.f32 %v961_v16, 0.0 }
 0x420   :  { %v980_v23 = vmax.f32 %v964_v18, 0.0 }
 0x421   :  { %v978_v25 = vmax.f32 %v962_v19, 0.0 }
 0x422   :  { %v988_v26 = vpack.c.bf16 %v980_v23, %v979_v21 }
 0x423   :  { %v987_v27 = vpack.c.bf16 %v978_v25, %v977_v24 }
 0x425   :  { %1639 = vmatprep.mubr.bf16.mxu0 %v987_v27 }
 0x426   :  { %1640 = vmatmul.mubr.bf16.gmra.mrb[44].mxu0 %v988_v26 }
 0x4e1   :  { %v1629_v28 = vpop.f32.mrb[32].mxu0 }
 0x4e2   :  { %v1087_v29 = vpop.f32.mrb[33].mxu0  ;;  %v1152_v45 = vmul.f32 %v1629_v28, %v2011_v40  ;;  %v2224_v28 = vld [vmem:[%s2278_s8] ss:$0 sm:$0xff]  ;;  %s1826_s8 = smov [#allocation8]  }
 0x4e3   :  { %v1630_v30 = vpop.f32.mrb[34].mxu0  ;;  %v1150_v49 = vmul.f32 %v1087_v29, %v2009_v39  ;;  %s1331_s19 = sshll.u32 %s1826_s8, 4  ;;  %s1332_s19 = int_to_ptr.vmem [resolvable:$true] %s1331_s19 }
 0x4e4   :  { %v1153_v51 = vmul.f32 %v1630_v30, %v2015_v42  ;;  %v1090_v47 = vpop.f32.mrb[35].mxu0  ;;  %s1792_s20 = scalar_lea.vmem %s1332_s19, 2048  ;;  %p1797_p11 = scmp.lt.s32.totalorder %s1332_s19, %s1332_s19 }
 0x4e5   :  { %v1151_v53 = vmul.f32 %v1090_v47, %v2013_v41  ;;  %p1793_p10 = scmp.ne.s32.totalorder %s1332_s19, %s1792_s20  ;;  %p1798_p12 = scmp.lt.s32.totalorder %s1792_s20, %s1792_s20 }
 0x4e6   :  { %v1167_v50 = vpack.c.bf16 %v1153_v51, %v1152_v45 }
 0x4e7   :  { %v1166_v52 = vpack.c.bf16 %v1151_v53, %v1150_v49  ;;  %p1799_p13 = por %p1798_p12, %p1797_p11 }
 0x4e9   :  { %v1633_v54 = vpop.f32.mrb[36].mxu0  ;;  %1643 = vmatprep.subr.bf16.mxu1 %v1166_v52  ;;  %p1800_p0 = pnand %p1799_p13, %p1793_p10 }
 0x4ea   :  { %v1103_v55 = vpop.f32.mrb[37].mxu0  ;;  %1644 = vmatpush3.bf16.msra.mxu1 %v1166_v52  ;;  %v1156_v56 = vmul.f32 %v1633_v54, %v2021_v46 }
 0x4eb   :  { %v1634_v33 = vpop.f32.mrb[38].mxu0  ;;  %1645 = vmatprep.subr.bf16.mxu1 %v1167_v50  ;;  %v1154_v61 = vmul.f32 %v1103_v55, %v2017_v43 }
 0x4ec   :  { %v1157_v59 = vmul.f32 %v1634_v33, %v2023_v48  ;;  %v1106_v60 = vpop.f32.mrb[39].mxu0 }
 0x4ed   :  { %v1155_v62 = vmul.f32 %v1106_v60, %v2019_v44 }
 0x4ee   :  { %v1169_v63 = vpack.c.bf16 %v1157_v59, %v1156_v56  ;;  %1646 = vmatpush3.bf16.msra.mxu1 %v1167_v50 }
 0x4ef   :  { %v1168_v0 = vpack.c.bf16 %v1155_v62, %v1154_v61 }
 0x4f1   :  { %v1637_v1 = vpop.f32.mrb[40].mxu0  ;;  %1647 = vmatprep.subr.bf16.mxu1 %v1168_v0 }
 0x4f2   :  { %v1119_v2 = vpop.f32.mrb[41].mxu0  ;;  %1648 = vmatpush3.bf16.msra.mxu1 %v1168_v0  ;;  %v1160_v6 = vmul.f32 %v1637_v1, %v2037_v3 }
 0x4f3   :  { %v1638_v4 = vpop.f32.mrb[42].mxu0  ;;  %1649 = vmatprep.subr.bf16.mxu1 %v1169_v63  ;;  %v1158_v9 = vmul.f32 %v1119_v2, %v2029_v57 }
 0x4f4   :  { %v1161_v7 = vmul.f32 %v1638_v4, %v2039_v5  ;;  %v1122_v8 = vpop.f32.mrb[43].mxu0 }
 0x4f5   :  { %v1159_v11 = vmul.f32 %v1122_v8, %v2031_v58 }
 0x4f6   :  { %v1171_v12 = vpack.c.bf16 %v1161_v7, %v1160_v6  ;;  %1650 = vmatpush3.bf16.msra.mxu1 %v1169_v63 }
 0x4f7   :  { %v1170_v13 = vpack.c.bf16 %v1159_v11, %v1158_v9 }
 0x4f9   :  { %v1641_v15 = vpop.f32.mrb[44].mxu0  ;;  %1651 = vmatprep.subr.bf16.mxu1 %v1170_v13 }
 0x4fa   :  { %v1135_v16 = vpop.f32.mrb[45].mxu0  ;;  %1652 = vmatpush3.bf16.msra.mxu1 %v1170_v13  ;;  %v1164_v18 = vmul.f32 %v1641_v15, %v2049_v20 }
 0x4fb   :  { %v1642_v17 = vpop.f32.mrb[46].mxu0  ;;  %1653 = vmatprep.subr.bf16.mxu1 %v1171_v12  ;;  %v1162_v23 = vmul.f32 %v1135_v16, %v2041_v10 }
 0x4fc   :  { %v1165_v19 = vmul.f32 %v1642_v17, %v2051_v22  ;;  %v1138_v21 = vpop.f32.mrb[47].mxu0 }
 0x4fd   :  { %v1163_v24 = vmul.f32 %v1138_v21, %v2045_v14 }
 0x4fe   :  { %v1173_v25 = vpack.c.bf16 %v1165_v19, %v1164_v18  ;;  %1654 = vmatpush3.bf16.msra.mxu1 %v1171_v12 }
 0x4ff   :  { %v1172_v26 = vpack.c.bf16 %v1163_v24, %v1162_v23 }
 0x501   :  { %1655 = vmatprep.subr.bf16.mxu1 %v1172_v26 }
 0x502   :  { %1656 = vmatpush3.bf16.msra.mxu1 %v1172_v26 }
 0x503   :  { %1657 = vmatprep.subr.bf16.mxu1 %v1173_v25 }
 0x506   :  { %1658 = vmatpush3.bf16.msra.mxu1 %v1173_v25 }
 0x509   :  { %1660 = vmatmul.mubr.bf16.vlgmr.msra.gmra.mrb[32].mxu1 %v2060_v31 }
 0x50a   :  { %1663 = vmatprep.mubr.bf16.mxu1 %v2065_v32 }
 0x511   :  { %1664 = vmatmul.mubr.bf16.gmra.mrb[36].mxu1 %v2072_v34 }
 0x512   :  { %1667 = vmatprep.mubr.bf16.mxu1 %v2077_v35 }
 0x519   :  { %1668 = vmatmul.mubr.bf16.gmra.mrb[40].mxu1 %v2084_v36 }
 0x51a   :  { %1671 = vmatprep.mubr.bf16.mxu1 %v2089_v37 }
 0x521   :  { %1672 = vmatmul.mubr.bf16.gmra.mrb[44].mxu1 %v2096_v38 }
 0x5dc   :  { %v1661_v27 = vpop.f32.mrb[32].mxu1 }
 0x5dd   :  { %v1273_v31 = vmul.f32 %v1661_v27, %v2011_v40  ;;  %v1208_v29 = vpop.f32.mrb[33].mxu1 }
 0x5de   :  { %v1271_v32 = vmul.f32 %v1208_v29, %v2009_v39  ;;  %v1662_v34 = vpop.f32.mrb[34].mxu1 }
 0x5df   :  { %v1296_v35 = vadd.f32 %v2224_v28, %v1273_v31  ;;  %v1274_v36 = vmul.f32 %v1662_v34, %v2015_v42  ;;  %v1211_v30 = vpop.f32.mrb[35].mxu1 }
 0x5e0   :  { %v1294_v37 = vadd.f32 %v2224_v28, %v1271_v32  ;;  %v1272_v38 = vmul.f32 %v1211_v30, %v2013_v41 }
 0x5e1   :  { %1312 = vst [vmem:[#allocation8 + $0x10] sm:$0xff] %v1296_v35  ;;  %v1297_v45 = vadd.f32 %v2224_v28, %v1274_v36 }
 0x5e2   :  { %1310 = vst [vmem:[#allocation8] sm:$0xff] %v1294_v37  ;;  %v1295_v51 = vadd.f32 %v2224_v28, %v1272_v38 }
 0x5e3   :  { %1313 = vst [vmem:[#allocation8 + $0x18] sm:$0xff] %v1297_v45 }
 0x5e4   :  { %1311 = vst [vmem:[#allocation8 + $0x8] sm:$0xff] %v1295_v51  ;;  %v1665_v40 = vpop.f32.mrb[36].mxu1 }
 0x5e5   :  { %v1277_v39 = vmul.f32 %v1665_v40, %v2021_v46  ;;  %v1224_v47 = vpop.f32.mrb[37].mxu1 }
 0x5e6   :  { %v1275_v49 = vmul.f32 %v1224_v47, %v2017_v43  ;;  %v1666_v42 = vpop.f32.mrb[38].mxu1 }
 0x5e7   :  { %v1300_v53 = vadd.f32 %v2224_v28, %v1277_v39  ;;  %v1278_v50 = vmul.f32 %v1666_v42, %v2023_v48  ;;  %v1227_v41 = vpop.f32.mrb[39].mxu1 }
 0x5e8   :  { %v1298_v52 = vadd.f32 %v2224_v28, %v1275_v49  ;;  %v1276_v54 = vmul.f32 %v1227_v41, %v2019_v44 }
 0x5e9   :  { %1316 = vst [vmem:[#allocation8 + $0x30] sm:$0xff] %v1300_v53  ;;  %v1301_v55 = vadd.f32 %v2224_v28, %v1278_v50 }
 0x5ea   :  { %1314 = vst [vmem:[#allocation8 + $0x20] sm:$0xff] %v1298_v52  ;;  %v1299_v33 = vadd.f32 %v2224_v28, %v1276_v54 }
 0x5eb   :  { %1317 = vst [vmem:[#allocation8 + $0x38] sm:$0xff] %v1301_v55 }
 0x5ec   :  { %1315 = vst [vmem:[#allocation8 + $0x28] sm:$0xff] %v1299_v33  ;;  %v1669_v46 = vpop.f32.mrb[40].mxu1 }
 0x5ed   :  { %v1281_v43 = vmul.f32 %v1669_v46, %v2037_v3  ;;  %v1240_v56 = vpop.f32.mrb[41].mxu1 }
 0x5ee   :  { %v1279_v59 = vmul.f32 %v1240_v56, %v2029_v57  ;;  %v1670_v48 = vpop.f32.mrb[42].mxu1 }
 0x5ef   :  { %v1304_v60 = vadd.f32 %v2224_v28, %v1281_v43  ;;  %v1282_v61 = vmul.f32 %v1670_v48, %v2039_v5  ;;  %v1243_v44 = vpop.f32.mrb[43].mxu1 }
 0x5f0   :  { %v1302_v62 = vadd.f32 %v2224_v28, %v1279_v59  ;;  %v1280_v63 = vmul.f32 %v1243_v44, %v2031_v58 }
 0x5f1   :  { %1320 = vst [vmem:[#allocation8 + $0x50] sm:$0xff] %v1304_v60  ;;  %v1305_v0 = vadd.f32 %v2224_v28, %v1282_v61 }
 0x5f2   :  { %1318 = vst [vmem:[#allocation8 + $0x40] sm:$0xff] %v1302_v62  ;;  %v1303_v1 = vadd.f32 %v2224_v28, %v1280_v63 }
 0x5f3   :  { %1321 = vst [vmem:[#allocation8 + $0x58] sm:$0xff] %v1305_v0 }
 0x5f4   :  { %1319 = vst [vmem:[#allocation8 + $0x48] sm:$0xff] %v1303_v1  ;;  %v1673_v3 = vpop.f32.mrb[44].mxu1 }
 0x5f5   :  { %v1285_v57 = vmul.f32 %v1673_v3, %v2049_v20  ;;  %v1256_v2 = vpop.f32.mrb[45].mxu1 }
 0x5f6   :  { %v1283_v4 = vmul.f32 %v1256_v2, %v2041_v10  ;;  %v1674_v5 = vpop.f32.mrb[46].mxu1 }
 0x5f7   :  { %v1308_v6 = vadd.f32 %v2224_v28, %v1285_v57  ;;  %v1286_v58 = vmul.f32 %v1674_v5, %v2051_v22  ;;  %v1259_v7 = vpop.f32.mrb[47].mxu1 }
 0x5f8   :  { %v1306_v8 = vadd.f32 %v2224_v28, %v1283_v4  ;;  %v1284_v9 = vmul.f32 %v1259_v7, %v2045_v14 }
 0x5f9   :  { %1324 = vst [vmem:[#allocation8 + $0x70] sm:$0xff] %v1308_v6  ;;  %v1309_v11 = vadd.f32 %v2224_v28, %v1286_v58 }
 0x5fa   :  { %1322 = vst [vmem:[#allocation8 + $0x60] sm:$0xff] %v1306_v8  ;;  %v1307_v20 = vadd.f32 %v2224_v28, %v1284_v9 }
 0x5fb   :  { %1325 = vst [vmem:[#allocation8 + $0x78] sm:$0xff] %v1309_v11 }
 0x5fc   :  { %1323 = vst [vmem:[#allocation8 + $0x68] sm:$0xff] %v1307_v20 }
 0x5fd   :  { %1803 = shalt.err (!%p1800_p0)
}
 0x5fe   :  { %s1804_s25 = scalar_lea.hbm %s2279_s9, 2048 }
 0x5ff   :  { %p1805_p1 = scmp.ne.s32.totalorder %s2279_s9, %s1804_s25  ;;  %p1808_p2 = scmp.lt.u32.totalorder %s1804_s25, %s2279_s9 }
 0x601   :  { %p1810_p3 = pnand %p1808_p2, %p1805_p1 }
 0x603   :  { %1813 = shalt.err (!%p1810_p3)
}
 0x604   :  { %s1827_s2 = smov 128   ;;  %s1828_s27 = smov 8  }
 0x605   :  { %1337 = dma.vmem_to_hbm [thread:$0]  %s1332_s19, 2048, %s2279_s9, [#allocation4], %s1827_s2, %s1827_s2, %s1828_s27  }
 0x606   :  { %1818 = dma.done.wait [#allocation4], 2048  }
 0x607   :  { %1819 = vsyncadd [#allocation4], 4294965248 }
 0x608   :  { %1341 = vsyncpa [#allocation3], 1 }
 0x609   :  { %1342 = vsyncpa [#allocation6], 1 }
 0x60a   :  { %1343 = vsyncpa [#allocation4], 1 }

</bundles_post_ra>
